<compile_context>
chip_gen: v5e
topology: v5e:2x2
jax: 0.10.0
libtpu: 0.0.40
codegen_flags: <defaults>
</compile_context>

<pallas_src>
import functools

import jax
import jax.numpy as jnp
import numpy as np
from jax.experimental import pallas as pl
from jax.experimental.pallas import tpu as pltpu


# ---------------------------------------------------------------------------
# Fused single-block kernel (instance fits in one VMEM tile): x read once.
# ---------------------------------------------------------------------------
def _simam_fused_kernel(x_ref, o_ref, *, s_true, e_lambda):
    x = x_ref[...].astype(jnp.float32)                      # (1, C, S_pad)
    inv_s = 1.0 / float(s_true)
    inv_n = 1.0 / float(max(s_true - 1, 1))

    # one-pass stats (padding is zeros -> does not perturb sum / sumsq)
    x_sum = jnp.sum(x, axis=-1, keepdims=True)              # (1, C, 1)
    x_sq = jnp.sum(x * x, axis=-1, keepdims=True)           # (1, C, 1)
    mean = x_sum * inv_s
    sum_d2 = jnp.maximum(x_sq - float(s_true) * mean * mean, 0.0)
    inv_den = 1.0 / (4.0 * (sum_d2 * inv_n + e_lambda))     # (1, C, 1)

    d = x - mean
    y = d * d * inv_den + 0.5
    o_ref[...] = (x * jax.nn.sigmoid(y)).astype(o_ref.dtype)


# ---------------------------------------------------------------------------
# Chunked path, kernel A: per-(b, c) sum / sumsq accumulation over S chunks.
# ---------------------------------------------------------------------------
def _simam_stats_kernel(x_ref, mean_ref, invden_ref, sum_acc, sq_acc,
                        *, s_true, e_lambda):
    s_idx = pl.program_id(1)

    @pl.when(s_idx == 0)
    def _():
        sum_acc[...] = jnp.zeros_like(sum_acc)
        sq_acc[...] = jnp.zeros_like(sq_acc)

    x = x_ref[...].astype(jnp.float32)                      # (1, C, chunk)
    sum_acc[...] += jnp.sum(x, axis=-1, keepdims=True)
    sq_acc[...] += jnp.sum(x * x, axis=-1, keepdims=True)

    @pl.when(s_idx == pl.num_programs(1) - 1)
    def _():
        inv_s = 1.0 / float(s_true)
        inv_n = 1.0 / float(max(s_true - 1, 1))
        mean = sum_acc[...] * inv_s
        sum_d2 = jnp.maximum(sq_acc[...] - float(s_true) * mean * mean, 0.0)
        mean_ref[...] = mean
        invden_ref[...] = 1.0 / (4.0 * (sum_d2 * inv_n + e_lambda))


# ---------------------------------------------------------------------------
# Chunked path, kernel B: point-wise apply (fully parallel, pipelined).
# ---------------------------------------------------------------------------
def _simam_apply_kernel(x_ref, mean_ref, invden_ref, o_ref):
    x = x_ref[...].astype(jnp.float32)                      # (1, C, chunk)
    d = x - mean_ref[...]                                   # broadcast (1, C, 1)
    y = d * d * invden_ref[...] + 0.5
    o_ref[...] = (x * jax.nn.sigmoid(y)).astype(o_ref.dtype)


# ---------------------------------------------------------------------------
# Tiling choice: lane-dense chunks, bounded VMEM per block.
# ---------------------------------------------------------------------------
def _choose_chunk(S, C, max_chunk, target_block_bytes=2 * 1024 * 1024):
    s128 = pl.cdiv(S, 128) * 128                  # minimal lane-aligned size
    cap = max(128, (target_block_bytes // (4 * max(C, 1))) // 128 * 128)
    chunk = max(128, min(s128, max_chunk, cap))
    s_pad = pl.cdiv(S, chunk) * chunk
    return chunk, s_pad


# ---------------------------------------------------------------------------
# Public forward: matches SimamModule.forward semantics.
# ---------------------------------------------------------------------------
def simam_forward(x, *, e_lambda=1e-4, max_chunk=2048):
    B, C, D, H, W = x.shape
    S = D * H * W
    chunk, s_pad = _choose_chunk(S, C, max_chunk)
    ns = s_pad // chunk

    x_flat = x.reshape(B, C, S)
    if s_pad != S:
        x_flat = jnp.pad(x_flat, ((0, 0), (0, 0), (0, s_pad - S)))

    if ns == 1:
        # Fused path: whole (padded) instance in one lane-dense block.
        out = pl.pallas_call(
            functools.partial(_simam_fused_kernel, s_true=S, e_lambda=e_lambda),
            out_shape=jax.ShapeDtypeStruct((B, C, s_pad), x.dtype),
            grid_spec=pltpu.PrefetchScalarGridSpec(
                num_scalar_prefetch=0,
                grid=(B,),
                in_specs=[pl.BlockSpec((1, C, s_pad), lambda b: (b, 0, 0))],
                out_specs=pl.BlockSpec((1, C, s_pad), lambda b: (b, 0, 0)),
            ),
            compiler_params=pltpu.CompilerParams(
                dimension_semantics=("parallel",)),
        )(x_flat)
    else:
        # Pass 1: streamed statistics with VMEM scratch accumulators.
        mean, invden = pl.pallas_call(
            functools.partial(_simam_stats_kernel, s_true=S, e_lambda=e_lambda),
            out_shape=(jax.ShapeDtypeStruct((B, C, 1), jnp.float32),
                       jax.ShapeDtypeStruct((B, C, 1), jnp.float32)),
            grid_spec=pltpu.PrefetchScalarGridSpec(
                num_scalar_prefetch=0,
                grid=(B, ns),
                in_specs=[pl.BlockSpec((1, C, chunk), lambda b, s: (b, 0, s))],
                out_specs=(pl.BlockSpec((1, C, 1), lambda b, s: (b, 0, 0)),
                           pl.BlockSpec((1, C, 1), lambda b, s: (b, 0, 0))),
                scratch_shapes=[pltpu.VMEM((1, C, 1), jnp.float32),
                                pltpu.VMEM((1, C, 1), jnp.float32)]),
            compiler_params=pltpu.CompilerParams(
                dimension_semantics=("parallel", "arbitrary")),
        )(x_flat)

        # Pass 2: point-wise application, fully parallel over (B, S-chunks).
        out = pl.pallas_call(
            _simam_apply_kernel,
            out_shape=jax.ShapeDtypeStruct((B, C, s_pad), x.dtype),
            grid_spec=pltpu.PrefetchScalarGridSpec(
                num_scalar_prefetch=0,
                grid=(B, ns),
                in_specs=[pl.BlockSpec((1, C, chunk), lambda b, s: (b, 0, s)),
                          pl.BlockSpec((1, C, 1), lambda b, s: (b, 0, 0)),
                          pl.BlockSpec((1, C, 1), lambda b, s: (b, 0, 0))],
                out_specs=pl.BlockSpec((1, C, chunk), lambda b, s: (b, 0, s)),
            ),
            compiler_params=pltpu.CompilerParams(
                dimension_semantics=("parallel", "parallel")),
        )(x_flat, mean, invden)

    if s_pad != S:
        out = out[:, :, :S]
    return out.reshape(B, C, D, H, W)


# ---------------------------------------------------------------------------
# Pure-JAX reference (mirrors the PyTorch SimamModule.forward).
# ---------------------------------------------------------------------------
def simam_reference(x, e_lambda=1e-4):
    b, c, d, h, w = x.shape
    n = d * h * w - 1
    x_mean = jnp.mean(x, axis=(2, 3, 4), keepdims=True)
    d2 = (x - x_mean) ** 2
    y = d2 / (4.0 * (jnp.sum(d2, axis=(2, 3, 4), keepdims=True) / n
                     + e_lambda)) + 0.5
    return x * jax.nn.sigmoid(y)


if __name__ == "__main__":
    key = jax.random.PRNGKey(0)
    k1, k2 = jax.random.split(key)

    # Case 1: lane-aligned spatial size -> single fused kernel path.
    x1 = jax.random.normal(k1, (2, 4, 8, 8, 8), dtype=jnp.float32)
    out1 = jax.block_until_ready(simam_forward(x1))
    np.testing.assert_allclose(np.asarray(out1), np.asarray(simam_reference(x1)),
                               atol=2e-4, rtol=2e-4)

    # Case 2: ragged spatial size (S = 210 -> padded) and forced S-chunking
    # to exercise the streamed two-pass path.
    x2 = 2.0 * jax.random.normal(k2, (2, 3, 5, 6, 7), dtype=jnp.float32) + 0.5
    out2 = jax.block_until_ready(simam_forward(x2, max_chunk=128))
    np.testing.assert_allclose(np.asarray(out2), np.asarray(simam_reference(x2)),
                               atol=2e-4, rtol=2e-4)

    print("KERNEL_OK")
</pallas_src>

<mosaic_0001>
module attributes {stable_mosaic.version = 11 : i64} {
  func.func @_simam_fused_kernel(%arg0: i32, %arg1: memref<1x4x512xf32, #tpu.memory_space<vmem>>, %arg2: memref<1x4x512xf32, #tpu.memory_space<vmem>>) attributes {dimension_semantics = [#tpu.dimension_semantics<parallel>], iteration_bounds = array<i64: 2>, scalar_prefetch = 0 : i64, scratch_operands = 0 : i64, tpu.core_type = #tpu.core_type<tc>, window_params = [{transform_indices = @transform_0, window_bounds = array<i64: 1, 4, 512>}, {transform_indices = @transform_1, window_bounds = array<i64: 1, 4, 512>}]} {
    %c0 = arith.constant 0 : index
    %c0_0 = arith.constant 0 : index
    %c0_1 = arith.constant 0 : index
    %0 = vector.load %arg1[%c0, %c0_0, %c0_1] : memref<1x4x512xf32, #tpu.memory_space<vmem>>, vector<1x4x512xf32>
    %cst = arith.constant dense<0.000000e+00> : vector<1x4xf32>
    %1 = vector.multi_reduction <add>, %0, %cst [2] : vector<1x4x512xf32> to vector<1x4xf32>
    %2 = vector.shape_cast %1 : vector<1x4xf32> to vector<1x4x1xf32>
    %3 = arith.mulf %0, %0 : vector<1x4x512xf32>
    %cst_2 = arith.constant dense<0.000000e+00> : vector<1x4xf32>
    %4 = vector.multi_reduction <add>, %3, %cst_2 [2] : vector<1x4x512xf32> to vector<1x4xf32>
    %5 = vector.shape_cast %4 : vector<1x4xf32> to vector<1x4x1xf32>
    %cst_3 = arith.constant 0.001953125 : f32
    %6 = vector.broadcast %cst_3 : f32 to vector<1x4x1xf32>
    %7 = arith.mulf %2, %6 : vector<1x4x1xf32>
    %cst_4 = arith.constant 5.120000e+02 : f32
    %8 = vector.broadcast %cst_4 : f32 to vector<1x4x1xf32>
    %9 = arith.mulf %8, %7 : vector<1x4x1xf32>
    %10 = arith.mulf %9, %7 : vector<1x4x1xf32>
    %11 = arith.subf %5, %10 : vector<1x4x1xf32>
    %cst_5 = arith.constant 0.000000e+00 : f32
    %12 = vector.broadcast %cst_5 : f32 to vector<1x4x1xf32>
    %13 = arith.maximumf %11, %12 : vector<1x4x1xf32>
    %cst_6 = arith.constant 0.00195694715 : f32
    %14 = vector.broadcast %cst_6 : f32 to vector<1x4x1xf32>
    %15 = arith.mulf %13, %14 : vector<1x4x1xf32>
    %cst_7 = arith.constant 9.99999974E-5 : f32
    %16 = vector.broadcast %cst_7 : f32 to vector<1x4x1xf32>
    %17 = arith.addf %15, %16 : vector<1x4x1xf32>
    %cst_8 = arith.constant 4.000000e+00 : f32
    %18 = vector.broadcast %cst_8 : f32 to vector<1x4x1xf32>
    %19 = arith.mulf %18, %17 : vector<1x4x1xf32>
    %cst_9 = arith.constant 1.000000e+00 : f32
    %20 = vector.broadcast %cst_9 : f32 to vector<1x4x1xf32>
    %21 = arith.divf %20, %19 : vector<1x4x1xf32>
    %22 = vector.broadcast %7 : vector<1x4x1xf32> to vector<1x4x512xf32>
    %23 = arith.subf %0, %22 : vector<1x4x512xf32>
    %24 = arith.mulf %23, %23 : vector<1x4x512xf32>
    %25 = vector.broadcast %21 : vector<1x4x1xf32> to vector<1x4x512xf32>
    %26 = arith.mulf %24, %25 : vector<1x4x512xf32>
    %cst_10 = arith.constant 5.000000e-01 : f32
    %27 = vector.broadcast %cst_10 : f32 to vector<1x4x512xf32>
    %28 = arith.addf %26, %27 : vector<1x4x512xf32>
    %29 = arith.negf %28 : vector<1x4x512xf32>
    %30 = math.exp %29 : vector<1x4x512xf32>
    %cst_11 = arith.constant 1.000000e+00 : f32
    %31 = vector.broadcast %cst_11 : f32 to vector<1x4x512xf32>
    %32 = arith.addf %31, %30 : vector<1x4x512xf32>
    %33 = arith.divf %31, %32 : vector<1x4x512xf32>
    %34 = arith.mulf %0, %33 : vector<1x4x512xf32>
    %c0_12 = arith.constant 0 : index
    %c0_13 = arith.constant 0 : index
    %c0_14 = arith.constant 0 : index
    %35 = vector.load %arg2[%c0_12, %c0_13, %c0_14] : memref<1x4x512xf32, #tpu.memory_space<vmem>>, vector<1x4x512xf32>
    tpu.vector_store %arg2[%c0_12, %c0_13, %c0_14], %34 {strides = array<i32>} : memref<1x4x512xf32, #tpu.memory_space<vmem>>, vector<1x4x512xf32>,
    return
  }
  func.func @transform_0(%arg0: i32) -> (i32, i32, i32) {
    %c0_i32 = arith.constant 0 : i32
    %c0_i32_0 = arith.constant 0 : i32
    %c0_i32_1 = arith.constant 0 : i32
    return %arg0, %c0_i32, %c0_i32_0 : i32, i32, i32
  }
  func.func @transform_1(%arg0: i32) -> (i32, i32, i32) {
    %c0_i32 = arith.constant 0 : i32
    %c0_i32_0 = arith.constant 0 : i32
    %c0_i32_1 = arith.constant 0 : i32
    return %arg0, %c0_i32, %c0_i32_0 : i32, i32, i32
  }
}

</mosaic_0001>

<bundles_post_ra>
// kernel: tpu_custom_call.1
= control target key start
LH: loop header
LB: loop body
LE: loop exit
PB: predicated region body
PF: predicated region fallthrough
CT: control target
= control target key end

     0   :  { %6 = vsyncpa [#allocation3], 0  ;;  %s693_s0 = inlined_call_operand.hbm [shape: f32[2,4,512], index: 0, kind: input, shape index: {}]   ;;  %s694_s1 = inlined_call_operand.hbm [shape: f32[2,4,512], index: 1, kind: output, shape index: {}]  }
   0x1   :  { %8 = vsyncpa [#allocation3 + $0x1], 0 }
   0x2   :  { %9 = vsyncpa [#allocation4], 0 }
   0x3   :  { %11 = vsyncpa [#allocation4 + $0x1], 0  ;;  %s540_s6 = smov 0   ;;  %s542_s7 = smov 0  }
   0x4   :  { %s544_s8 = smov 0   ;;  %s546_s9 = smov 0  }
   0x5 LB: > { %s561_s10 = sadd.s32 4294967295, %s527_s9   ;;  %s356_s11 = sadd.s32 4294967294, %s527_s9   ;;  %s527_s9 = sphi %s546_s9, %s704_s9   ;;  %s523_s8 = sphi %s544_s8, %s703_s8   ;;  %s519_s7 = sphi %s542_s7, %s702_s7   ;;  %s515_s6 = sphi %s540_s6, %s701_s6  }
   0x6   : > { %s565_s12 = sadd.s32 1, %s527_s9   ;;  %s24_s13 = sadd.s32 1, %s523_s8 }
   0x7   : > { %s21_s14 = ssub.s32 %s527_s9, %s565_s12  ;;  %p31_p0 = scmp.ne.s32.totalorder %s523_s8, %s519_s7 }
   0x8   : > { %p22_p1 = scmp.eq.s32.totalorder %s21_s14, 0  ;;  %p32_p2 = scmp.eq.s32.totalorder %s527_s9, 0 }
   0x9   : > { %p37_p3 = scmp.ne.s32.totalorder %s519_s7, %s515_s6  ;;  %p38_p4 = scmp.eq.s32.totalorder %s561_s10, 0 }
   0xa   : > { %s577_s15 = scalar_select %p22_p1, %s523_s8, %s24_s13  }
   0xb   : > { %p579_p5 = por %p32_p2, %p31_p0  ;;  %p583_p6 = por %p38_p4, %p37_p3 }
   0xc   : > { %p61_p7 = scmp.eq.s32.totalorder %s561_s10, 1  ;;  %p67_p8 = scmp.eq.s32.totalorder %s356_s11, 1 }
   0xd   : > { %p386_p10 = scmp.lt.s32.totalorder %s527_s9, 2  ;;  %s87_s20 = sand.u32 1, %s523_s8  }
   0xe   : > { %p590_p11 = por %p61_p7, %p31_p0  ;;  %p594_p12 = por %p67_p8, %p37_p3 }
   0xf   : > { %s372_s21 = sshll.u32 %s527_s9, 4  ;;  %s359_s22 = sshll.u32 %s87_s20, 4 }
  0x10   : > { %s96_s25 = scalar_lea.hbm %s693_s0, %s372_s21  ;;  %s91_s27 = scalar_lea.vmem [#allocation2], %s359_s22 }
  0x11   : > { %s98_s26 = sshll.u32 %s96_s25, 4  ;;  %s100_s28 = sshll.u32 %s91_s27, 4  ;;  %s99_s26 = int_to_ptr.hbm [resolvable:$true] %s98_s26  ;;  %s101_s28 = int_to_ptr.vmem [resolvable:$true] %s100_s28 }
  0x12   : > { %p605_p13 = pnand %p386_p10, %p579_p5  ;;  %p362_p0 = scmp.ge.s32.totalorder %s527_s9, 1 }
  0x13   : > { %p105_p1 = scmp.lt.s32.totalorder %s527_s9, 3  ;;  %s88_s30 = scalar_lea.sflag [#allocation3], %s87_s20 }
  0x14   : > { %s431_s2 = sshra.s32 %s99_s26, 4  ;;  %p435_p3 = pneg %p605_p13  ;;  %s432_s2 = int_to_ptr.hbm [resolvable:$true] %s431_s2 }
  0x15   : > { %s433_s3 = scalar_lea.hbm %s432_s2, 16  ;;  %s438_s11 = scalar_lea.hbm %s693_s0, 32 }
  0x16   : > { %p434_p2 = scmp.ne.s32.totalorder %s432_s2, %s433_s3  ;;  %p439_p5 = scmp.lt.s32.totalorder %s432_s2, %s693_s0 }
  0x17   : > { %p440_p8 = scmp.lt.s32.totalorder %s438_s11, %s433_s3 }
  0x18   : > { %p436_p4 = pnand %p435_p3, %p434_p2 }
  0x19   : > { %p441_p10 = por %p440_p8, %p439_p5 }
  0x1a   : > { %p437_p7 = pneg %p436_p4 }
  0x1c   : > { %p442_p9 = pnand %p441_p10, %p437_p7 }
  0x1e   : > { %445 = shalt.err (!%p442_p9)
}
  0x1f   : > { %381 = dma.hbm_to_vmem [thread:$0]  (!%p605_p13), %s99_s26, 256, %s101_s28, %s88_s30  }
  0x20   : > { %p106_p2 = pnand %p362_p0, %p105_p1 }
  0x21   : > { %s626_s16 = sand.u32 (!%p106_p2), 1, %s519_s7  }
  0x22   : > { %109 = sbr.rel (%p106_p2) target bundleno = 249 (0xf9), region = 24  ;;  %s363_s20 = sshll.u32 (!%p106_p2), %s626_s16, 4 }
  0x23   : > { %s112_s21 = scalar_lea.sflag (!%p106_p2), [#allocation3], %s626_s16  ;;  %s115_s22 = scalar_lea.vmem (!%p106_p2), [#allocation2], %s363_s20 }
  0x27   : > { %506 = dma.done.wait (%p583_p6), %s112_s21, 256  }
  0x28   : > { %508 = vsyncadd (%p583_p6), %s112_s21, 4294967040  ;;  %v636_v0 = vld [vmem:[%s115_s22] sm:$0xff]  ;;  %v638_v1 = vld [vmem:[%s115_s22 + $0x8] sm:$0xff]  ;;  %vm150_vm0 = vcmask 1043456   ;;  %v529_v36 = vmov 839922192  }
  0x29   : > { %139 = vst [vmem:[#allocation1] ss:$2 sm:$0xff] %v636_v0  ;;  %v160_v2 = vmul.f32 %v636_v0, %v636_v0  ;;  %v161_v3 = vmul.f32 %v638_v1, %v638_v1  ;;  %v209_v37 = vunpack.c.l.s4 %v529_v36  ;;  %s373_s17 = sshll.u32 %s561_s10, 4  ;;  %s134_s10 = scalar_lea.vmem [#allocation5], %s363_s20 }
  0x2a   : > { %141 = vst [vmem:[#allocation1 + $0x10] ss:$2 sm:$0xff] %v638_v1  ;;  %s281_s25 = scalar_lea.hbm %s694_s1, %s373_s17  ;;  %s283_s26 = sshll.u32 %s134_s10, 4  ;;  %s284_s26 = int_to_ptr.vmem [resolvable:$true] %s283_s26 }
  0x2b   : > { %v210_v38 = vunpack.c.0.s8 %v209_v37  ;;  %s285_s27 = sshll.u32 %s281_s25, 4  ;;  %s270_s28 = scalar_lea.sflag [#allocation4], %s626_s16  ;;  %s286_s27 = int_to_ptr.hbm [resolvable:$true] %s285_s27 }
  0x2c   : > { %s475_s29 = sshra.s32 %s286_s27, 4  ;;  %s481_s4 = scalar_lea.hbm %s694_s1, 32  ;;  %s476_s29 = int_to_ptr.hbm [resolvable:$true] %s475_s29 }
  0x2d   : > { %s477_s30 = scalar_lea.hbm %s476_s29, 16  ;;  %p482_p0 = scmp.lt.s32.totalorder %s476_s29, %s694_s1 }
  0x2e   : > { %p478_p6 = scmp.ne.s32.totalorder %s476_s29, %s477_s30  ;;  %p483_p1 = scmp.lt.s32.totalorder %s481_s4, %s477_s30 }
  0x30   : > { %v142_v4 = vld.sshfl [vmem:[#allocation1] sm:$0xff pattern:$0x75316420]  ;;  %v143_v5 = vld.sshfl [vmem:[#allocation1 + $0x8] sm:$0xff pattern:$0x75316420]  ;;  %p479_p9 = pnand %p478_p6, %p590_p11  ;;  %p484_p3 = por %p483_p1, %p482_p0 }
  0x31   : > { %v144_v6 = vld.sshfl [vmem:[#allocation1 + $0x10] sm:$0xff pattern:$0x75316420]  ;;  %v145_v7 = vld.sshfl [vmem:[#allocation1 + $0x18] sm:$0xff pattern:$0x75316420] }
  0x32   : > { %v151_v8 = vsel %vm150_vm0, %v142_v4, 0.0  ;;  %v152_v9 = vsel %vm150_vm0, %v143_v5, 0.0  ;;  %v154_v10 = vsel %vm150_vm0, %v144_v6, 0.0  ;;  %164 = vst [vmem:[#allocation1] ss:$2 sm:$0xff] %v160_v2  ;;  %v156_v12 = vsel %vm150_vm0, %v145_v7, 0.0  ;;  %p480_p13 = pneg %p479_p9 }
  0x33   : > { %v153_v11 = vadd.f32 %v152_v9, %v151_v8  ;;  %166 = vst [vmem:[#allocation1 + $0x10] ss:$2 sm:$0xff] %v161_v3 }
  0x34   : > { %p485_p4 = pnand %p484_p3, %p480_p13 }
  0x35   : > { %v155_v13 = vadd.f32 %v154_v10, %v153_v11 }
  0x37   : > { %v157_v14 = vadd.f32 %v156_v12, %v155_v13 }
  0x39   : > { %158 = vadd.xlane.f32.xlu0 %v157_v14  ;;  %v167_v15 = vld.sshfl [vmem:[#allocation1] sm:$0xff pattern:$0x75316420]  ;;  %v168_v16 = vld.sshfl [vmem:[#allocation1 + $0x8] sm:$0xff pattern:$0x75316420] }
  0x3a   : > { %v169_v17 = vld.sshfl [vmem:[#allocation1 + $0x10] sm:$0xff pattern:$0x75316420]  ;;  %v170_v18 = vld.sshfl [vmem:[#allocation1 + $0x18] sm:$0xff pattern:$0x75316420] }
  0x3b   : > { %v175_v19 = vsel %vm150_vm0, %v167_v15, 0.0  ;;  %v176_v20 = vsel %vm150_vm0, %v168_v16, 0.0  ;;  %v178_v21 = vsel %vm150_vm0, %v169_v17, 0.0  ;;  %v180_v23 = vsel %vm150_vm0, %v170_v18, 0.0 }
  0x3c   : > { %v177_v22 = vadd.f32 %v176_v20, %v175_v19 }
  0x3e   : > { %v179_v24 = vadd.f32 %v178_v21, %v177_v22 }
  0x40   : > { %v181_v25 = vadd.f32 %v180_v23, %v179_v24 }
  0x42   : > { %182 = vadd.xlane.f32.xlu0 %v181_v25 }
  0xac   : > { %v159_v26 = vpop.xlane.xlu0 %158 }
  0xad   : > { %v184_v27 = vmul.f32 0.001953125, %v159_v26 }
  0xaf   : > { %v185_v28 = vmul.f32 512.0, %v184_v27  ;;  %v211_v41 = vperm.slane %v184_v27, %v210_v38 }
  0xb1   : > { %v186_v29 = vmul.f32 %v185_v28, %v184_v27  ;;  %v213_v46 = vsub.f32 %v636_v0, %v211_v41  ;;  %v214_v47 = vsub.f32 %v638_v1, %v211_v41 }
  0xb3   : > { %v215_v52 = vmul.f32 %v213_v46, %v213_v46  ;;  %v216_v53 = vmul.f32 %v214_v47, %v214_v47 }
  0xb5   : > { %v183_v30 = vpop.xlane.xlu0 %182 }
  0xb6   : > { %v187_v31 = vsub.f32 %v183_v30, %v186_v29 }
  0xb8   : > { %v188_v32 = vmax.f32 %v187_v31, 0.0 }
  0xba   : > { %v189_v33 = vmul.f32 0.0019569471, %v188_v32 }
  0xbc   : > { %v190_v34 = vadd.f32 0.0001, %v189_v33 }
  0xbe   : > { %v191_v35 = vmul.f32 4.0, %v190_v34 }
  0xc0   : > { %421 = vrcp.f32 %v191_v35  ;;  %v203_v43 = vand.u32 2147483648, %v191_v35  ;;  %v201_v45 = vand.u32 2147483647, %v191_v35  ;;  %vm197_vm2 = vweird.f32 %v191_v35 }
  0xc2   : > { %v204_v49 = vor.u32 1.1754944e-38, %v203_v43  ;;  %vm202_vm4 = vcmp.eq.f32.partialorder %v201_v45, 8.507059e+37 }
  0xc6   : > { %v422_v39 = vpop.eup %421 }
  0xc7   : > { %v193_v40 = vmul.f32 %v422_v39, %v191_v35  ;;  %vm198_vm1 = vweird.f32 %v422_v39 }
  0xc8   : > { %vm199_vm3 = vmor %vm197_vm2, %vm198_vm1 }
  0xc9   : > { %v194_v42 = vsub.f32 1.0, %v193_v40 }
  0xcb   : > { %v195_v44 = vmul.f32 %v422_v39, %v194_v42 }
  0xcd   : > { %v196_v48 = vadd.f32 %v422_v39, %v195_v44 }
  0xcf   : > { %v200_v50 = vsel %vm199_vm3, %v422_v39, %v196_v48 }
  0xd0   : > { %v205_v51 = vsel %vm202_vm4, %v204_v49, %v200_v50 }
  0xd1   : > { %v221_v54 = vperm.slane %v205_v51, %v210_v38 }
  0xd3   : > { %v223_v55 = vmul.f32 %v221_v54, %v215_v52  ;;  %v224_v56 = vmul.f32 %v221_v54, %v216_v53 }
  0xd5   : > { %v225_v57 = vadd.f32 0.5, %v223_v55  ;;  %v226_v58 = vadd.f32 0.5, %v224_v56 }
  0xd7   : > { %v365_v59 = vmul.f32 -1.442695, %v225_v57  ;;  %v366_v60 = vmul.f32 -1.442695, %v226_v58 }
  0xd9   : > { %423 = vpow2.f32 %v365_v59 }
  0xda   : > { %425 = vpow2.f32 %v366_v60 }
  0xdf   : > { %v424_v61 = vpop.eup %423 }
  0xe0   : > { %v426_v62 = vpop.eup %425  ;;  %v233_v63 = vadd.f32 1.0, %v424_v61 }
  0xe1   : > { %v234_v2 = vadd.f32 1.0, %v426_v62 }
  0xe2   : > { %427 = vrcp.f32 %v233_v63  ;;  %v246_v8 = vand.u32 2147483648, %v233_v63  ;;  %v244_v11 = vand.u32 2147483647, %v233_v63  ;;  %vm240_vm7 = vweird.f32 %v233_v63 }
  0xe3   : > { %429 = vrcp.f32 %v234_v2  ;;  %v261_v12 = vand.u32 2147483648, %v234_v2  ;;  %v259_v14 = vand.u32 2147483647, %v234_v2  ;;  %vm255_vm9 = vweird.f32 %v234_v2 }
  0xe4   : > { %v247_v16 = vor.u32 1.1754944e-38, %v246_v8  ;;  %vm245_vm10 = vcmp.eq.f32.partialorder %v244_v11, 8.507059e+37 }
  0xe5   : > { %v262_v19 = vor.u32 1.1754944e-38, %v261_v12  ;;  %vm260_vm12 = vcmp.eq.f32.partialorder %v259_v14, 8.507059e+37 }
  0xe8   : > { %v428_v3 = vpop.eup %427 }
  0xe9   : > { %v430_v4 = vpop.eup %429  ;;  %v236_v5 = vmul.f32 %v428_v3, %v233_v63  ;;  %vm241_vm5 = vweird.f32 %v428_v3 }
  0xea   : > { %v251_v6 = vmul.f32 %v430_v4, %v234_v2  ;;  %vm256_vm6 = vweird.f32 %v430_v4  ;;  %vm242_vm8 = vmor %vm240_vm7, %vm241_vm5 }
  0xeb   : > { %v237_v7 = vsub.f32 1.0, %v236_v5  ;;  %vm257_vm11 = vmor %vm255_vm9, %vm256_vm6 }
  0xec   : > { %v252_v9 = vsub.f32 1.0, %v251_v6 }
  0xed   : > { %v238_v10 = vmul.f32 %v428_v3, %v237_v7 }
  0xee   : > { %v253_v13 = vmul.f32 %v430_v4, %v252_v9 }
  0xef   : > { %v239_v15 = vadd.f32 %v428_v3, %v238_v10 }
  0xf0   : > { %v254_v17 = vadd.f32 %v430_v4, %v253_v13 }
  0xf1   : > { %v243_v18 = vsel %vm242_vm8, %v428_v3, %v239_v15 }
  0xf2   : > { %v248_v20 = vsel %vm245_vm10, %v247_v16, %v243_v18  ;;  %v258_v21 = vsel %vm257_vm11, %v430_v4, %v254_v17 }
  0xf3   : > { %v263_v22 = vsel %vm260_vm12, %v262_v19, %v258_v21  ;;  %v265_v23 = vmul.f32 %v248_v20, %v636_v0 }
  0xf4   : > { %v266_v24 = vmul.f32 %v263_v22, %v638_v1 }
  0xf5   : > { %267 = vst [vmem:[%s134_s10] sm:$0xff] %v265_v23 }
  0xf6   : > { %268 = vst [vmem:[%s134_s10 + $0x8] sm:$0xff] %v266_v24 }
  0xf7   : > { %488 = shalt.err (!%p485_p4)
}
  0xf8   : > { %376 = dma.vmem_to_hbm [thread:$0]  (%p590_p11), %s284_s26, 256, %s286_s27, %s270_s28  }
  0xf9 PF: > { %s297_s13 = sand.u32 1, %s515_s6   ;;  %p700_p7 = scmp.ge.s32.totalorder %s527_s9, 2 }
  0xfa   : > { %s298_s14 = scalar_lea.sflag [#allocation4], %s297_s13 }
  0xfb   : > { %p383_p5 = pnand %p700_p7, %p594_p12 }
  0xfd   : > { %p384_p8 = pneg %p383_p5 }
  0xff   : > { %510 = dma.done.wait (%p384_p8), %s298_s14, 256  }
 0x100   : > { %512 = vsyncadd (%p384_p8), %s298_s14, 4294967040  ;;  %p14_p10 = scmp.ge.s32.totalorder %s565_s12, 4   ;;  %s701_s6 = smov %s519_s7 }
 0x101   : > { %s702_s7 = smov %s523_s8  ;;  %s703_s8 = smov %s577_s15 }
 0x102   : > { %s704_s9 = smov %s565_s12  ;;  %16 = sbr.rel (!%p14_p10) target bundleno = 5 (0x5), region = 71 }
 0x107   :  { %304 = vsyncpa [#allocation3], 1 }
 0x108   :  { %306 = vsyncpa [#allocation3 + $0x1], 1 }
 0x109   :  { %307 = vsyncpa [#allocation4], 1 }
 0x10a   :  { %309 = vsyncpa [#allocation4 + $0x1], 1 }

</bundles_post_ra>
